<compile_context>
chip_gen: v7x
topology: tpu7x:2x2x1
jax: 0.10.0
libtpu: 0.0.40
codegen_flags: <defaults>
</compile_context>

<pallas_src>
import functools

import jax
import jax.numpy as jnp
from jax import lax
from jax.experimental import pallas as pl
from jax.experimental.pallas import tpu as pltpu


def _round_up(v, m):
    return (v + m - 1) // m * m


def _pick_row_tile(H, W, Cin, itemsize, target_block_bytes):
    # Row-tile heights: divisors of H whose lane extent T*W is a multiple of 128
    # (legal BlockSpec / unmasked vst) or the full plane.
    cands = [t for t in range(1, H + 1)
             if H % t == 0 and ((t * W) % 128 == 0 or t == H)]
    fitting = [t for t in cands if t * W * Cin * itemsize <= target_block_bytes]
    return max(fitting) if fitting else min(cands)


def _fpn_output_kernel(cmask_ref, rmask_ref, x_ref, halo_ref, w_ref, o_ref,
                       acc_ref, *, T, W):
    TW = T * W
    x = x_ref[0]                               # (Cin_p, TW), compute dtype
    cl = cmask_ref[0:1, :]                     # valid where src col c-1 exists
    cr = cmask_ref[1:2, :]                     # valid where src col c+1 exists

    # Column taps: pre-masked lane rolls (XLU slot), stacked along the contraction dim.
    x_l = pltpu.roll(x, 1, 1) * cl             # value at p is x[p-1], zeroed at col 0
    x_r = pltpu.roll(x, TW - 1, 1) * cr        # value at p is x[p+1], zeroed at col W-1
    xs = jnp.concatenate([x_l, x, x_r], axis=0)        # (3*Cin_p, TW)

    # kh = 1 (center row): no row shift / mask; initializes the accumulator.
    acc_ref[...] = jnp.dot(w_ref[1], xs, preferred_element_type=jnp.float32)

    # kh = 0 (source row i-1): in-tile part via lane roll; wrapped row 0 zeroed
    # POST-matmul (output-sized multiply).
    y0 = jnp.dot(w_ref[0], pltpu.roll(xs, W, 1), preferred_element_type=jnp.float32)
    acc_ref[...] += rmask_ref[0:1, :] * y0

    # kh = 2 (source row i+1): wrapped last row zeroed post-matmul.
    y2 = jnp.dot(w_ref[2], pltpu.roll(xs, TW - W, 1), preferred_element_type=jnp.float32)
    acc_ref[...] += rmask_ref[1:2, :] * y2

    # Halo corrections: the rows just above / below this tile contribute only to the
    # tile's first / last output row -> two tiny (Ncls_p, W) matmuls.
    acc_ref[:, 0:W] += jnp.dot(w_ref[0], halo_ref[0, 0],
                               preferred_element_type=jnp.float32)
    acc_ref[:, TW - W:TW] += jnp.dot(w_ref[2], halo_ref[0, 1],
                                     preferred_element_type=jnp.float32)

    o_ref[0] = acc_ref[...].astype(o_ref.dtype)


def fpn_output_pallas(x_nchw, w1_oihw, w2_oihw, *, compute_dtype=None,
                      row_tile=None, target_block_bytes=2 << 20):
    """x: (N,Cin,H,W); w1: (Cmid,Cin,3,3); w2: (Ncls,Cmid,1,1) -> (N,Ncls,H,W)."""
    N, Cin, H, W = x_nchw.shape
    Ncls = w2_oihw.shape[0]
    out_dtype = x_nchw.dtype
    cdt = jnp.dtype(compute_dtype) if compute_dtype is not None else jnp.dtype(x_nchw.dtype)

    # ---- Fuse 3x3 + 1x1 conv (exact: norm_layer=None -> no nonlinearity between). ----
    w2_2d = w2_oihw[:, :, 0, 0].astype(jnp.float32)
    w_eff = jnp.einsum('om,mchw->hwoc', w2_2d, w1_oihw.astype(jnp.float32))  # (3,3,Ncls,Cin)

    # ---- Pad channel dims to sublane multiples (full MXU pops / unmasked stores). ----
    Ncls_p = _round_up(Ncls, 8)
    Cin_p = _round_up(Cin, 8)
    w_eff = jnp.pad(w_eff, ((0, 0), (0, 0), (0, Ncls_p - Ncls), (0, Cin_p - Cin)))
    # Stack the kw taps along the contraction dim: (3, Ncls_p, 3*Cin_p), order kw=0,1,2.
    w_rows = jnp.concatenate([w_eff[:, 0], w_eff[:, 1], w_eff[:, 2]], axis=-1).astype(cdt)

    x4 = x_nchw.astype(cdt)
    if Cin_p != Cin:
        x4 = jnp.pad(x4, ((0, 0), (0, Cin_p - Cin), (0, 0), (0, 0)))

    # ---- Spatial row tiling. ----
    T = row_tile if row_tile is not None else _pick_row_tile(
        H, W, Cin_p, cdt.itemsize, target_block_bytes)
    assert H % T == 0 and ((T * W) % 128 == 0 or T == H), (T, H, W)
    nt = H // T
    TW = T * W

    x_flat = x4.reshape(N, Cin_p, H * W)       # lane-dense: flattened spatial on lanes

    # ---- Halo rows (row above / below each tile, zeros at image borders), column-
    # stacked + column-masked in the wrapper -> tiny (N*nt, 2, 3*Cin_p, W) side input. ----
    zrow = jnp.zeros((N, Cin_p, 1, W), cdt)
    top_rows = jnp.concatenate([zrow, x4[:, :, T - 1:H - 1:T, :]], axis=2)  # (N,Cin_p,nt,W)
    bot_rows = jnp.concatenate([x4[:, :, T:H:T, :], zrow], axis=2)          # (N,Cin_p,nt,W)

    def colstack(rows):                        # (N,Cin_p,nt,W) -> (N,nt,3*Cin_p,W)
        z = jnp.zeros_like(rows[..., :1])
        left = jnp.concatenate([z, rows[..., :-1]], axis=-1)    # value at c is row[c-1]
        right = jnp.concatenate([rows[..., 1:], z], axis=-1)    # value at c is row[c+1]
        s = jnp.concatenate([left, rows, right], axis=1)        # (N,3*Cin_p,nt,W)
        return jnp.transpose(s, (0, 2, 1, 3))

    halo = jnp.stack([colstack(top_rows), colstack(bot_rows)], axis=2)      # (N,nt,2,3C,W)
    halo = halo.reshape(N * nt, 2, 3 * Cin_p, W).astype(cdt)

    # ---- Precomputed 0/1 masks (tile-local, shared by every grid step). ----
    col = jnp.tile(jnp.arange(W, dtype=jnp.int32), T)
    row = jnp.repeat(jnp.arange(T, dtype=jnp.int32), W)
    cmask = jnp.stack([col >= 1, col <= W - 2]).astype(cdt)          # pre-matmul (input)
    rmask = jnp.stack([row >= 1, row <= T - 2]).astype(jnp.float32)  # post-matmul (output)

    kernel = functools.partial(_fpn_output_kernel, T=T, W=W)

    # Explicit VMEM budget: double-buffered blocks + stacked temporaries + headroom.
    isz = cdt.itemsize
    est = (2 * (Cin_p * TW * isz + 2 * 3 * Cin_p * W * isz
                + Ncls_p * TW * jnp.dtype(out_dtype).itemsize)
           + 3 * Ncls_p * 3 * Cin_p * isz
           + 2 * TW * (isz + 4)
           + Ncls_p * TW * 4
           + 4 * 3 * Cin_p * TW * isz)
    vmem_limit = int(min(48 << 20, max(16 << 20, 4 * est)))

    out = pl.pallas_call(
        kernel,
        out_shape=jax.ShapeDtypeStruct((N, Ncls_p, H * W), out_dtype),
        grid_spec=pltpu.PrefetchScalarGridSpec(
            num_scalar_prefetch=0,
            grid=(N, nt),
            in_specs=[
                pl.BlockSpec((2, TW), lambda n, t: (0, 0)),                        # cmask
                pl.BlockSpec((2, TW), lambda n, t: (0, 0)),                        # rmask
                pl.BlockSpec((1, Cin_p, TW), lambda n, t: (n, 0, t)),              # x
                pl.BlockSpec((1, 2, 3 * Cin_p, W),
                             lambda n, t: (n * nt + t, 0, 0, 0)),                  # halo
                pl.BlockSpec((3, Ncls_p, 3 * Cin_p), lambda n, t: (0, 0, 0)),      # weights
            ],
            out_specs=pl.BlockSpec((1, Ncls_p, TW), lambda n, t: (n, 0, t)),
            scratch_shapes=[pltpu.VMEM((Ncls_p, TW), jnp.float32)],
        ),
        compiler_params=pltpu.CompilerParams(
            dimension_semantics=("parallel", "parallel"),
            vmem_limit_bytes=vmem_limit),
    )(cmask, rmask, x_flat, halo, w_rows)

    return out.reshape(N, Ncls_p, H, W)[:, :Ncls]


def _kaiming_normal(key, shape, fan_in, a=1.0):
    std = (2.0 / (1.0 + a * a)) ** 0.5 / (fan_in ** 0.5)
    return std * jax.random.normal(key, shape, dtype=jnp.float32)


def _reference(x_nchw, w1_oihw, w2_oihw):
    y = lax.conv_general_dilated(
        x_nchw, w1_oihw, window_strides=(1, 1), padding=((1, 1), (1, 1)),
        dimension_numbers=("NCHW", "OIHW", "NCHW"))
    y = lax.conv_general_dilated(
        y, w2_oihw, window_strides=(1, 1), padding=((0, 0), (0, 0)),
        dimension_numbers=("NCHW", "OIHW", "NCHW"))
    return y


if __name__ == "__main__":
    # FPNOutput(in_chan=4, mid_chan=8, n_classes=5), input (2, 4, 16, 16)
    N, Cin, H, W = 2, 4, 16, 16
    Cmid, Ncls = 8, 5

    key = jax.random.PRNGKey(0)
    kx, k1, k2 = jax.random.split(key, 3)
    x = jax.random.normal(kx, (N, Cin, H, W), dtype=jnp.float32)
    w1 = _kaiming_normal(k1, (Cmid, Cin, 3, 3), fan_in=Cin * 3 * 3)
    w2 = _kaiming_normal(k2, (Ncls, Cmid, 1, 1), fan_in=Cmid)

    ref = _reference(x, w1, w2)

    # f32, spatially tiled (2 row tiles per image -> exercises the halo-correction path).
    out = jax.block_until_ready(fpn_output_pallas(x, w1, w2, row_tile=8))
    assert out.shape == (N, Ncls, H, W)
    err = float(jnp.max(jnp.abs(out - ref)))
    assert jnp.allclose(out, ref, atol=1e-4, rtol=1e-4), f"tiled f32 max abs err {err}"

    # f32, auto-picked tile (full-plane / single-tile path).
    out_full = jax.block_until_ready(fpn_output_pallas(x, w1, w2))
    err = float(jnp.max(jnp.abs(out_full - ref)))
    assert jnp.allclose(out_full, ref, atol=1e-4, rtol=1e-4), f"full f32 max abs err {err}"

    # bf16 operands with f32 accumulation (v6e / v7x MXU fast path); looser tolerance.
    out_bf16 = jax.block_until_ready(
        fpn_output_pallas(x, w1, w2, compute_dtype=jnp.bfloat16, row_tile=8))
    err = float(jnp.max(jnp.abs(out_bf16.astype(jnp.float32) - ref)))
    assert jnp.allclose(out_bf16.astype(jnp.float32), ref, atol=6e-2, rtol=5e-2), \
        f"bf16 max abs err {err}"

    print("KERNEL_OK")
</pallas_src>

<mosaic_0001>
module attributes {stable_mosaic.version = 11 : i64} {
  func.func @_fpn_output_kernel(%arg0: i32, %arg1: i32, %arg2: memref<2x128xf32, #tpu.memory_space<vmem>>, %arg3: memref<2x128xf32, #tpu.memory_space<vmem>>, %arg4: memref<1x8x128xf32, #tpu.memory_space<vmem>>, %arg5: memref<1x2x24x16xf32, #tpu.memory_space<vmem>>, %arg6: memref<3x8x24xf32, #tpu.memory_space<vmem>>, %arg7: memref<1x8x128xf32, #tpu.memory_space<vmem>>, %arg8: memref<8x128xf32, #tpu.memory_space<vmem>>) attributes {dimension_semantics = [#tpu.dimension_semantics<parallel>, #tpu.dimension_semantics<parallel>], iteration_bounds = array<i64: 2, 2>, scalar_prefetch = 0 : i64, scratch_operands = 1 : i64, tpu.core_type = #tpu.core_type<tc>, window_params = [{pipeline_mode = #tpu.pipeline_mode<synchronous>, transform_indices = @transform_0, window_bounds = array<i64: 2, 128>}, {pipeline_mode = #tpu.pipeline_mode<synchronous>, transform_indices = @transform_1, window_bounds = array<i64: 2, 128>}, {transform_indices = @transform_2, window_bounds = array<i64: 1, 8, 128>}, {transform_indices = @transform_3, window_bounds = array<i64: 1, 2, 24, 16>}, {pipeline_mode = #tpu.pipeline_mode<synchronous>, transform_indices = @transform_4, window_bounds = array<i64: 3, 8, 24>}, {transform_indices = @transform_5, window_bounds = array<i64: 1, 8, 128>}]} {
    %c0 = arith.constant 0 : index
    %c0_0 = arith.constant 0 : index
    %c0_1 = arith.constant 0 : index
    %0 = vector.load %arg4[%c0, %c0_0, %c0_1] : memref<1x8x128xf32, #tpu.memory_space<vmem>>, vector<1x8x128xf32>
    %1 = vector.shape_cast %0 : vector<1x8x128xf32> to vector<8x128xf32>
    %c0_2 = arith.constant 0 : index
    %c0_3 = arith.constant 0 : index
    %2 = vector.load %arg2[%c0_2, %c0_3] : memref<2x128xf32, #tpu.memory_space<vmem>>, vector<1x128xf32>
    %c1 = arith.constant 1 : index
    %c0_4 = arith.constant 0 : index
    %3 = vector.load %arg2[%c1, %c0_4] : memref<2x128xf32, #tpu.memory_space<vmem>>, vector<1x128xf32>
    %c1_i32 = arith.constant 1 : i32
    %4 = tpu.dynamic_rotate %1 by %c1_i32 dim 1 : vector<8x128xf32>, i32 -> vector<8x128xf32>
    %5 = vector.broadcast %2 : vector<1x128xf32> to vector<8x128xf32>
    %6 = arith.mulf %4, %5 : vector<8x128xf32>
    %c127_i32 = arith.constant 127 : i32
    %7 = tpu.dynamic_rotate %1 by %c127_i32 dim 1 : vector<8x128xf32>, i32 -> vector<8x128xf32>
    %8 = vector.broadcast %3 : vector<1x128xf32> to vector<8x128xf32>
    %9 = arith.mulf %7, %8 : vector<8x128xf32>
    %10 = tpu.concatenate %6, %1, %9 in 0 : vector<8x128xf32>, vector<8x128xf32>, vector<8x128xf32> -> vector<24x128xf32>
    %c1_5 = arith.constant 1 : index
    %c0_6 = arith.constant 0 : index
    %c0_7 = arith.constant 0 : index
    %11 = vector.load %arg6[%c1_5, %c0_6, %c0_7] : memref<3x8x24xf32, #tpu.memory_space<vmem>>, vector<1x8x24xf32>
    %12 = vector.shape_cast %11 : vector<1x8x24xf32> to vector<8x24xf32>
    %cst = arith.constant dense<0.000000e+00> : vector<8x128xf32>
    %13 = tpu.matmul %12, %10, %cst {dimension_numbers = #tpu.dot_dimension_numbers<[1], [0], [0], [1], [0, 0, 1, 1], [], []>} : vector<8x24xf32>, vector<24x128xf32>, vector<8x128xf32> -> vector<8x128xf32>
    %c0_8 = arith.constant 0 : index
    %c0_9 = arith.constant 0 : index
    %14 = vector.load %arg8[%c0_8, %c0_9] : memref<8x128xf32, #tpu.memory_space<vmem>>, vector<8x128xf32>
    tpu.vector_store %arg8[%c0_8, %c0_9], %13 {strides = array<i32>} : memref<8x128xf32, #tpu.memory_space<vmem>>, vector<8x128xf32>,
    %c0_10 = arith.constant 0 : index
    %c0_11 = arith.constant 0 : index
    %c0_12 = arith.constant 0 : index
    %15 = vector.load %arg6[%c0_10, %c0_11, %c0_12] : memref<3x8x24xf32, #tpu.memory_space<vmem>>, vector<1x8x24xf32>
    %16 = vector.shape_cast %15 : vector<1x8x24xf32> to vector<8x24xf32>
    %c16_i32 = arith.constant 16 : i32
    %17 = tpu.dynamic_rotate %10 by %c16_i32 dim 1 : vector<24x128xf32>, i32 -> vector<24x128xf32>
    %cst_13 = arith.constant dense<0.000000e+00> : vector<8x128xf32>
    %18 = tpu.matmul %16, %17, %cst_13 {dimension_numbers = #tpu.dot_dimension_numbers<[1], [0], [0], [1], [0, 0, 1, 1], [], []>} : vector<8x24xf32>, vector<24x128xf32>, vector<8x128xf32> -> vector<8x128xf32>
    %c0_14 = arith.constant 0 : index
    %c0_15 = arith.constant 0 : index
    %19 = vector.load %arg8[%c0_14, %c0_15] : memref<8x128xf32, #tpu.memory_space<vmem>>, vector<8x128xf32>
    %c0_16 = arith.constant 0 : index
    %c0_17 = arith.constant 0 : index
    %20 = vector.load %arg3[%c0_16, %c0_17] : memref<2x128xf32, #tpu.memory_space<vmem>>, vector<1x128xf32>
    %21 = vector.broadcast %20 : vector<1x128xf32> to vector<8x128xf32>
    %22 = arith.mulf %21, %18 : vector<8x128xf32>
    %23 = arith.addf %19, %22 : vector<8x128xf32>
    %c0_18 = arith.constant 0 : index
    %c0_19 = arith.constant 0 : index
    %24 = vector.load %arg8[%c0_18, %c0_19] : memref<8x128xf32, #tpu.memory_space<vmem>>, vector<8x128xf32>
    tpu.vector_store %arg8[%c0_18, %c0_19], %23 {strides = array<i32>} : memref<8x128xf32, #tpu.memory_space<vmem>>, vector<8x128xf32>,
    %c2 = arith.constant 2 : index
    %c0_20 = arith.constant 0 : index
    %c0_21 = arith.constant 0 : index
    %25 = vector.load %arg6[%c2, %c0_20, %c0_21] : memref<3x8x24xf32, #tpu.memory_space<vmem>>, vector<1x8x24xf32>
    %26 = vector.shape_cast %25 : vector<1x8x24xf32> to vector<8x24xf32>
    %c112_i32 = arith.constant 112 : i32
    %27 = tpu.dynamic_rotate %10 by %c112_i32 dim 1 : vector<24x128xf32>, i32 -> vector<24x128xf32>
    %cst_22 = arith.constant dense<0.000000e+00> : vector<8x128xf32>
    %28 = tpu.matmul %26, %27, %cst_22 {dimension_numbers = #tpu.dot_dimension_numbers<[1], [0], [0], [1], [0, 0, 1, 1], [], []>} : vector<8x24xf32>, vector<24x128xf32>, vector<8x128xf32> -> vector<8x128xf32>
    %c0_23 = arith.constant 0 : index
    %c0_24 = arith.constant 0 : index
    %29 = vector.load %arg8[%c0_23, %c0_24] : memref<8x128xf32, #tpu.memory_space<vmem>>, vector<8x128xf32>
    %c1_25 = arith.constant 1 : index
    %c0_26 = arith.constant 0 : index
    %30 = vector.load %arg3[%c1_25, %c0_26] : memref<2x128xf32, #tpu.memory_space<vmem>>, vector<1x128xf32>
    %31 = vector.broadcast %30 : vector<1x128xf32> to vector<8x128xf32>
    %32 = arith.mulf %31, %28 : vector<8x128xf32>
    %33 = arith.addf %29, %32 : vector<8x128xf32>
    %c0_27 = arith.constant 0 : index
    %c0_28 = arith.constant 0 : index
    %34 = vector.load %arg8[%c0_27, %c0_28] : memref<8x128xf32, #tpu.memory_space<vmem>>, vector<8x128xf32>
    tpu.vector_store %arg8[%c0_27, %c0_28], %33 {strides = array<i32>} : memref<8x128xf32, #tpu.memory_space<vmem>>, vector<8x128xf32>,
    %c0_29 = arith.constant 0 : index
    %c0_30 = arith.constant 0 : index
    %35 = vector.load %arg8[%c0_29, %c0_30] : memref<8x128xf32, #tpu.memory_space<vmem>>, vector<8x16xf32>
    %c0_31 = arith.constant 0 : index
    %c0_32 = arith.constant 0 : index
    %c0_33 = arith.constant 0 : index
    %36 = vector.load %arg6[%c0_31, %c0_32, %c0_33] : memref<3x8x24xf32, #tpu.memory_space<vmem>>, vector<1x8x24xf32>
    %37 = vector.shape_cast %36 : vector<1x8x24xf32> to vector<8x24xf32>
    %c0_34 = arith.constant 0 : index
    %c0_35 = arith.constant 0 : index
    %c0_36 = arith.constant 0 : index
    %c0_37 = arith.constant 0 : index
    %38 = vector.load %arg5[%c0_34, %c0_35, %c0_36, %c0_37] : memref<1x2x24x16xf32, #tpu.memory_space<vmem>>, vector<1x1x24x16xf32>
    %39 = vector.shape_cast %38 : vector<1x1x24x16xf32> to vector<24x16xf32>
    %cst_38 = arith.constant dense<0.000000e+00> : vector<8x16xf32>
    %40 = tpu.matmul %37, %39, %cst_38 {dimension_numbers = #tpu.dot_dimension_numbers<[1], [0], [0], [1], [0, 0, 1, 1], [], []>} : vector<8x24xf32>, vector<24x16xf32>, vector<8x16xf32> -> vector<8x16xf32>
    %41 = arith.addf %35, %40 : vector<8x16xf32>
    %c0_39 = arith.constant 0 : index
    %c0_40 = arith.constant 0 : index
    %42 = vector.load %arg8[%c0_39, %c0_40] : memref<8x128xf32, #tpu.memory_space<vmem>>, vector<8x16xf32>
    tpu.vector_store %arg8[%c0_39, %c0_40], %41 {strides = array<i32>} : memref<8x128xf32, #tpu.memory_space<vmem>>, vector<8x16xf32>,
    %c0_41 = arith.constant 0 : index
    %c112 = arith.constant 112 : index
    %43 = vector.load %arg8[%c0_41, %c112] : memref<8x128xf32, #tpu.memory_space<vmem>>, vector<8x16xf32>
    %c2_42 = arith.constant 2 : index
    %c0_43 = arith.constant 0 : index
    %c0_44 = arith.constant 0 : index
    %44 = vector.load %arg6[%c2_42, %c0_43, %c0_44] : memref<3x8x24xf32, #tpu.memory_space<vmem>>, vector<1x8x24xf32>
    %45 = vector.shape_cast %44 : vector<1x8x24xf32> to vector<8x24xf32>
    %c0_45 = arith.constant 0 : index
    %c1_46 = arith.constant 1 : index
    %c0_47 = arith.constant 0 : index
    %c0_48 = arith.constant 0 : index
    %46 = vector.load %arg5[%c0_45, %c1_46, %c0_47, %c0_48] : memref<1x2x24x16xf32, #tpu.memory_space<vmem>>, vector<1x1x24x16xf32>
    %47 = vector.shape_cast %46 : vector<1x1x24x16xf32> to vector<24x16xf32>
    %cst_49 = arith.constant dense<0.000000e+00> : vector<8x16xf32>
    %48 = tpu.matmul %45, %47, %cst_49 {dimension_numbers = #tpu.dot_dimension_numbers<[1], [0], [0], [1], [0, 0, 1, 1], [], []>} : vector<8x24xf32>, vector<24x16xf32>, vector<8x16xf32> -> vector<8x16xf32>
    %49 = arith.addf %43, %48 : vector<8x16xf32>
    %c0_50 = arith.constant 0 : index
    %c112_51 = arith.constant 112 : index
    %50 = vector.load %arg8[%c0_50, %c112_51] : memref<8x128xf32, #tpu.memory_space<vmem>>, vector<8x16xf32>
    tpu.vector_store %arg8[%c0_50, %c112_51], %49 {strides = array<i32>} : memref<8x128xf32, #tpu.memory_space<vmem>>, vector<8x16xf32>,
    %c0_52 = arith.constant 0 : index
    %c0_53 = arith.constant 0 : index
    %51 = vector.load %arg8[%c0_52, %c0_53] : memref<8x128xf32, #tpu.memory_space<vmem>>, vector<8x128xf32>
    %c0_54 = arith.constant 0 : index
    %c0_55 = arith.constant 0 : index
    %c0_56 = arith.constant 0 : index
    %52 = vector.load %arg7[%c0_54, %c0_55, %c0_56] : memref<1x8x128xf32, #tpu.memory_space<vmem>>, vector<1x8x128xf32>
    %53 = vector.shape_cast %52 : vector<1x8x128xf32> to vector<8x128xf32>
    %54 = vector.shape_cast %51 : vector<8x128xf32> to vector<1x8x128xf32>
    tpu.vector_store %arg7[%c0_54, %c0_55, %c0_56], %54 {strides = array<i32>} : memref<1x8x128xf32, #tpu.memory_space<vmem>>, vector<1x8x128xf32>,
    return
  }
  func.func @transform_0(%arg0: i32, %arg1: i32) -> (i32, i32) {
    %c0_i32 = arith.constant 0 : i32
    %c0_i32_0 = arith.constant 0 : i32
    %c0_i32_1 = arith.constant 0 : i32
    return %c0_i32, %c0_i32_0 : i32, i32
  }
  func.func @transform_1(%arg0: i32, %arg1: i32) -> (i32, i32) {
    %c0_i32 = arith.constant 0 : i32
    %c0_i32_0 = arith.constant 0 : i32
    %c0_i32_1 = arith.constant 0 : i32
    return %c0_i32, %c0_i32_0 : i32, i32
  }
  func.func @transform_2(%arg0: i32, %arg1: i32) -> (i32, i32, i32) {
    %c0_i32 = arith.constant 0 : i32
    %c0_i32_0 = arith.constant 0 : i32
    return %arg0, %c0_i32, %arg1 : i32, i32, i32
  }
  func.func @transform_3(%arg0: i32, %arg1: i32) -> (i32, i32, i32, i32) {
    %c2_i32 = arith.constant 2 : i32
    %0 = arith.muli %arg0, %c2_i32 : i32
    %1 = arith.addi %0, %arg1 : i32
    %c0_i32 = arith.constant 0 : i32
    %c0_i32_0 = arith.constant 0 : i32
    %c0_i32_1 = arith.constant 0 : i32
    %c0_i32_2 = arith.constant 0 : i32
    return %1, %c0_i32, %c0_i32_0, %c0_i32_1 : i32, i32, i32, i32
  }
  func.func @transform_4(%arg0: i32, %arg1: i32) -> (i32, i32, i32) {
    %c0_i32 = arith.constant 0 : i32
    %c0_i32_0 = arith.constant 0 : i32
    %c0_i32_1 = arith.constant 0 : i32
    %c0_i32_2 = arith.constant 0 : i32
    return %c0_i32, %c0_i32_0, %c0_i32_1 : i32, i32, i32
  }
  func.func @transform_5(%arg0: i32, %arg1: i32) -> (i32, i32, i32) {
    %c0_i32 = arith.constant 0 : i32
    %c0_i32_0 = arith.constant 0 : i32
    return %arg0, %c0_i32, %arg1 : i32, i32, i32
  }
}

</mosaic_0001>

<bundles_post_ra>
// kernel: tpu_custom_call.1
= control target key start
LH: loop header
LB: loop body
LE: loop exit
PB: predicated region body
PF: predicated region fallthrough
CT: control target
= control target key end

     0   :  { %10 = vsyncpa [#allocation4], 0  ;;  %s1359_s0 = inlined_call_operand.vmem [shape: f32[2,128], index: 0, kind: input, shape index: {}]   ;;  %s1360_s1 = inlined_call_operand.vmem [shape: f32[2,128], index: 1, kind: input, shape index: {}]   ;;  %s1361_s2 = inlined_call_operand.vmem [shape: f32[2,8,256], index: 2, kind: input, shape index: {}]   ;;  %s1362_s3 = inlined_call_operand.vmem [shape: f32[4,2,24,16], index: 3, kind: input, shape index: {}]   ;;  %s1363_s4 = inlined_call_operand.vmem [shape: f32[3,8,24], index: 4, kind: input, shape index: {}]   ;;  %s1364_s5 = inlined_call_operand.hbm [shape: f32[2,8,256], index: 5, kind: output, shape index: {}]  }
   0x1   :  { %12 = vsyncpa [#allocation4 + $0x1], 0  ;;  %s1165_s18 = smov 0   ;;  %s1167_s19 = smov 0  }
   0x2   :  { %s1169_s20 = smov 0   ;;  %s1171_s21 = smov 0  }
   0x3   :  { %s1173_s22 = smov 0   ;;  %s1175_s23 = smov 0  }
   0x4   :  { %s1177_s24 = smov 0   ;;  %s1179_s25 = smov 0  }
   0x5 LB: > { %s830_s26 = sadd.s32 4294967295, %s1125_s25   ;;  %s831_s27 = sadd.s32 4294967294, %s1125_s25   ;;  %s1125_s25 = sphi %s1179_s25, %s18_s25   ;;  %s1121_s24 = sphi %s1177_s24, %s1373_s24   ;;  %s1117_s23 = sphi %s1175_s23, %s1372_s23   ;;  %s1113_s22 = sphi %s1173_s22, %s1371_s22   ;;  %s1109_s21 = sphi %s1171_s21, %s1370_s21   ;;  %s1105_s20 = sphi %s1169_s20, %s1369_s20   ;;  %s1101_s19 = sphi %s1167_s19, %s1368_s19   ;;  %s1097_s18 = sphi %s1165_s18, %s1367_s18  }
   0x6   : > { %s27_s28 = sadd.s32 1, %s1117_s23  ;;  %s30_s29 = sadd.s32 1, %s1121_s24 }
   0x7   : > { %p28_p0 = scmp.ge.s32.totalorder %s27_s28, 2  ;;  %p170_p1 = scmp.ne.s32.totalorder %s1105_s20, %s1101_s19 }
   0x8   : > { %p171_p2 = scmp.eq.s32.totalorder %s830_s26, 3  ;;  %p176_p5 = scmp.ne.s32.totalorder %s1101_s19, %s1097_s18 }
   0x9   : > { %s1375_s28 = smov (%p28_p0, %s27_s28), 0  ;;  %s1377_s29 = smov (!%p28_p0, %s30_s29), %s1121_s24 }
   0xa   : > { %s156_s30 = ssub.s32 %s1117_s23, %s1375_s28  ;;  %p1216_p3 = por %p171_p2, %p170_p1 }
   0xb   : > { %p32_p4 = scmp.ge.s32.totalorder %s1377_s29, 2  ;;  %p177_p6 = scmp.eq.s32.totalorder %s831_s27, 3 }
   0xc   : > { %p836_p7 = scmp.ge.s32.totalorder %s1125_s25, 1  ;;  %p227_p9 = scmp.lt.s32.totalorder %s1125_s25, 5 }
   0xd   : > { %s1379_s29 = smov (%p32_p4, %s1377_s29), 0  ;;  %p1225_p8 = por %p177_p6, %p176_p5 }
   0xe   : > { %s155_s8 = ssub.s32 %s1121_s24, %s1379_s29  ;;  %s160_s9 = sadd.s32 1, %s1105_s20 }
   0xf   : > { %s157_s10 = sor.u32 %s156_s30, %s155_s8  ;;  %p228_p10 = pnand %p836_p7, %p227_p9 }
  0x10   : > { %p158_p11 = scmp.eq.s32.totalorder %s157_s10, 0  ;;  %p265_p12 = scmp.lt.s32.totalorder (!%p228_p10), %s1113_s22, 1  ;;  %v1127_v0 = vmov (!%p228_p10), 0.0|0.0   ;;  %vm1130_vm0 = vmmov (!%p228_p10), 0   ;;  %v1131_v2 = vmov (!%p228_p10), 0.0   ;;  %v844_v11 = vld [vmem:[%s1363_s4 + $0x8] sm:$0xff] (!%p228_p10) }
  0x11   : > { %231 = sbr.rel (%p228_p10) target bundleno = 632 (0x278), region = 40  ;;  %p267_p13 = scmp.lt.s32.totalorder (!%p228_p10), %s1109_s21, 1  ;;  %927 = vmatprep.subr.bf16.mxu0 (!%p228_p10), %v1127_v0  ;;  %930 = vmatprep.subr.bf16.mxu1 (!%p228_p10), %v1127_v0  ;;  %v842_v3 = vld [vmem:[%s1359_s0] ss:$0 sm:$0xff] (!%p228_p10)  ;;  %v843_v6 = vld [vmem:[%s1359_s0 + $0x1] ss:$0 sm:$0xff] (!%p228_p10) }
  0x12   : > { %s1234_s11 = scalar_select %p158_p11, %s1105_s20, %s160_s9  }
  0x13   : > { %s1128_s30 = smov (!%p228_p10), 1   ;;  %s1129_s8 = smov (!%p228_p10), 127   ;;  %888 = vmatprep.mubr.msk.f32.mxu0 (!%p228_p10), %vm1130_vm0, %v1131_v2  ;;  %897 = vmatprep.mubr.msk.f32.mxu1 (!%p228_p10), %vm1130_vm0, %v1131_v2  ;;  %vm301_vm1 = vcmask (!%p228_p10), 195584   ;;  %v376_v25 = vld [vmem:[%s1363_s4] sm:$0xff] (!%p228_p10)  ;;  %v848_v26 = vld [vmem:[%s1363_s4 + $0x10] sm:$0xff] (!%p228_p10)  ;;  %vm634_vm2 = vcmask (!%p228_p10), 130048  }
  0x14   : > { %s840_s26 = sshll.u32 (!%p228_p10), %s1113_s22, 1  ;;  %v847_v34 = vld [vmem:[%s1360_s1] ss:$0 sm:$0xff] (!%p228_p10)  ;;  %v850_v35 = vld [vmem:[%s1360_s1 + $0x1] ss:$0 sm:$0xff] (!%p228_p10)  ;;  %vm720_vm3 = vcmask (!%p228_p10), 1048448  }
  0x18   : > { %s266_s12 = scalar_select %p265_p12, %s1113_s22, 1 }
  0x19   : > { %s268_s13 = scalar_select %p267_p13, %s1109_s21, 1 }
  0x1a   : > { %s838_s14 = sshll.u32 %s266_s12, 1 }
  0x1b   : > { %s270_s15 = sadd.s32 %s838_s14, %s268_s13  ;;  %s1132_s14 = smov 16  }
  0x1c   : > { %s839_s16 = sshll.u32 %s270_s15, 3  ;;  %s1133_s15 = smov 112  }
  0x1d   : > { %s272_s27 = scalar_lea.vmem %s1361_s2, %s839_s16 }
  0x1e   : > { %v282_v1 = vld [vmem:[%s272_s27] sm:$0xff]  ;;  %s1267_s27 = sadd.s32 %s1109_s21, %s840_s26 }
  0x1f   : > { %285 = vrot.lane.b32.xlu0 %v282_v1, %s1128_s30  ;;  %p275_p0 = scmp.lt.s32.totalorder %s1267_s27, 3  ;;  %s859_s10 = sshll.u32 %s1267_s27, 7 }
  0x21   : > { %s276_s30 = scalar_select %p275_p0, %s1267_s27, 3 }
  0x22   : > { %s1134_s27 = smov [#allocation3]  }
  0x23   : > { %292 = vrot.lane.b32.xlu0 %v282_v1, %s1129_s8  ;;  %s942_s8 = smul.u32 48, %s276_s30  ;;  %s1035_s17 = sshll.u32 %s1134_s27, 4  ;;  %s1036_s17 = int_to_ptr.vmem [resolvable:$false] %s1035_s17 }
  0x24   : > { %s1037_s26 = scalar_lea.vmem %s1036_s17, 256 }
  0x25   : > { %s279_s12 = scalar_lea.vmem %s1362_s3, %s942_s8  ;;  %s262_s8 = sand.u32 1, %s1101_s19  }
  0x26   : > { %v853_v21 = vld [vmem:[%s279_s12 + $0x18] sm:$0xff]  ;;  %v854_v22 = vld [vmem:[%s279_s12 + $0x20] sm:$0xff]  ;;  %v558_v24 = vld [vmem:[%s279_s12 + $0x8] sm:$0xff]  ;;  %s837_s9 = sshll.u32 %s262_s8, 3 }
  0x27   : > { %v557_v23 = vld [vmem:[%s279_s12] sm:$0xff]  ;;  %v940_v28 = vpack.c.bf16 %v854_v22, %v853_v21  ;;  %v855_v30 = vld [vmem:[%s279_s12 + $0x28] sm:$0xff]  ;;  %v559_v31 = vld [vmem:[%s279_s12 + $0x10] sm:$0xff]  ;;  %s264_s12 = scalar_lea.vmem [#allocation3], %s837_s9 }
  0x28   : > { %v937_v29 = vpack.c.bf16 %v558_v24, %v557_v23  ;;  %s740_s21 = sshll.u32 %s264_s12, 4  ;;  %s1308_s21 = int_to_ptr.vmem [resolvable:$true] %s740_s21 }
  0x29   : > { %s1031_s16 = scalar_lea.vmem %s1308_s21, 128  ;;  %p1038_p5 = scmp.lt.s32.totalorder %s1308_s21, %s1036_s17 }
  0x2a   : > { %p1032_p1 = scmp.ne.s32.totalorder %s1308_s21, %s1031_s16  ;;  %p1039_p6 = scmp.lt.s32.totalorder %s1037_s26, %s1031_s16 }
  0x2c   : > { %p1033_p2 = pnand %p1032_p1, %p1216_p3  ;;  %p1040_p7 = por %p1039_p6, %p1038_p5 }
  0x2e   : > { %p1034_p4 = pneg %p1033_p2 }
  0x30   : > { %p1041_p9 = pnand %p1040_p7, %p1034_p4 }
  0x91   : > { %v286_v4 = vpop.permute.xlu0 %285 }
  0x92   : > { %v291_v5 = vmul.f32 %v842_v3, %v286_v4 }
  0x94   : > { %v1026_v7 = vpack.i.bf16 %v282_v1, %v291_v5  ;;  %v928_v8 = vpack.c.bf16 %v282_v1, %v291_v5 }
  0x95   : > { %v293_v9 = vpop.permute.xlu0 %292 }
  0x96   : > { %1027 = vrot.lane.b32.xlu0 %v1026_v7, %s1132_s14  ;;  %1022 = vrot.lane.b32.xlu1 %v1026_v7, %s1133_s15  ;;  %v298_v10 = vmul.f32 %v843_v6, %v293_v9 }
  0x97   : > { %929 = vmatpush3.bf16.msra.mxu0 %v928_v8 }
  0x98   : > { %886 = vmatprep.subr.mxu0 %v1131_v2 }
  0x9a   : > { %471 = vrot.lane.b32.xlu1 %v298_v10, %s1133_s15 }
  0x9b   : > { %887 = vmatpush3.msra.mxu0 %v298_v10 }
  0x9c   : > { %889 = vmatmul.mubr.msk.f32.vlgmr.msra.gmra.mrb[0].mxu0 %vm301_vm1, %v844_v11  ;;  %933 = vmatprep.subr.bf16.mxu0 %v1127_v0 }
  0x9d   : > { %906 = vmatprep.mubr.msk.f32.mxu0 %vm1130_vm0, %v1131_v2 }
  0x9e   : > { %381 = vrot.lane.b32.xlu1 %v298_v10, %s1132_s14  ;;  %s725_s14 = scalar_lea.sflag [#allocation4], %s262_s8 }
 0x108   : > { %v1023_v12 = vpop.permute.xlu1 %1022  ;;  %v1028_v13 = vpop.permute.xlu0 %1027 }
 0x109   : > { %v1025_v14 = vunpack.i.h.bf16 %v1023_v12  ;;  %v1024_v15 = vunpack.i.l.bf16 %v1023_v12  ;;  %v1030_v16 = vunpack.i.h.bf16 %v1028_v13  ;;  %v1029_v17 = vunpack.i.l.bf16 %v1028_v13 }
 0x10b   : > { %v934_v18 = vpack.c.bf16 %v1025_v14, %v1024_v15  ;;  %v931_v19 = vpack.c.bf16 %v1030_v16, %v1029_v17 }
 0x10c   : > { %v472_v20 = vpop.permute.xlu1 %471 }
 0x10d   : > { %932 = vmatpush3.bf16.msra.mxu1 %v931_v19  ;;  %935 = vmatpush3.bf16.msra.mxu0 %v934_v18 }
 0x10e   : > { %895 = vmatprep.subr.mxu1 %v1131_v2  ;;  %904 = vmatprep.subr.mxu0 %v1131_v2 }
 0x110   : > { %v382_v27 = vpop.permute.xlu1 %381 }
 0x111   : > { %896 = vmatpush3.msra.mxu1 %v382_v27  ;;  %905 = vmatpush3.msra.mxu0 %v472_v20 }
 0x112   : > { %898 = vmatmul.mubr.msk.f32.vlgmr.msra.gmra.mrb[0].mxu1 %vm301_vm1, %v376_v25  ;;  %907 = vmatmul.mubr.msk.f32.vlgmr.msra.gmra.mrb[2].mxu0 %vm301_vm1, %v848_v26 }
 0x113   : > { %939 = vmatprep.subr.bf16.mxu0 %v1127_v0  ;;  %924 = vmatprep.mubr.msk.f32.mxu0 %vm1130_vm0, %v1131_v2 }
 0x114   : > { %941 = vmatpush3.bf16.msra.mxu0 %v940_v28  ;;  %936 = vmatprep.subr.bf16.mxu1 %v1127_v0 }
 0x115   : > { %922 = vmatprep.subr.mxu0 %v1131_v2  ;;  %938 = vmatpush3.bf16.msra.mxu1 %v937_v29 }
 0x116   : > { %913 = vmatprep.subr.mxu1 %v1131_v2  ;;  %915 = vmatprep.mubr.msk.f32.mxu1 %vm1130_vm0, %v1131_v2 }
 0x118   : > { %923 = vmatpush3.msra.mxu0 %v855_v30 }
 0x119   : > { %925 = vmatmul.mubr.msk.f32.vlgmr.msra.gmra.mrb[4].mxu0 %vm301_vm1, %v848_v26  ;;  %914 = vmatpush3.msra.mxu1 %v559_v31 }
 0x11a   : > { %916 = vmatmul.mubr.msk.f32.vlgmr.msra.gmra.mrb[2].mxu1 %vm301_vm1, %v376_v25 }
 0x16f   : > { %v371_v32 = vpop.f32.mrb[0].mxu0 }
 0x170   : > { %v890_v33 = vpop.f32.mrb[1].mxu0 }
 0x1e5   : > { %v452_v36 = vpop.f32.mrb[0].mxu1  ;;  %v542_v37 = vpop.f32.mrb[2].mxu0 }
 0x1e6   : > { %v462_v38 = vmul.f32 %v847_v34, %v452_v36  ;;  %v552_v39 = vmul.f32 %v850_v35, %v542_v37  ;;  %v908_v40 = vpop.f32.mrb[3].mxu0  ;;  %v899_v41 = vpop.f32.mrb[1].mxu1 }
 0x1e8   : > { %v463_v42 = vadd.f32 %v462_v38, %v371_v32 }
 0x1ea   : > { %v553_v43 = vadd.f32 %v552_v39, %v463_v42 }
 0x1ec   : > { %554 = vst [vmem:[#allocation2] sm:$0xff] %v553_v43  ;;  %v711_v44 = vpop.f32.mrb[4].mxu0 }
 0x1ed   : > { %716 = vrot.lane.b32.xlu0 %v711_v44, %s1133_s15  ;;  %v926_v45 = vpop.f32.mrb[5].mxu0  ;;  %v629_v46 = vpop.f32.mrb[2].mxu1  ;;  %s1306_s15 = scalar_lea.hbm %s1364_s5, %s859_s10 }
 0x1ee   : > { %v633_v47 = vadd.f32 %v629_v46, %v553_v43  ;;  %v917_v48 = vpop.f32.mrb[3].mxu1 }
 0x1f0   : > { %635 = vst.msk [vmem:[#allocation2] sm:$0xff] %vm634_vm2, %v633_v47 }
 0x1f7   : > { %v636_v50 = vld [vmem:[#allocation2] sm:$0xff] }
 0x25f   : > { %v717_v49 = vpop.permute.xlu0 %716 }
 0x260   : > { %v719_v51 = vadd.f32 %v717_v49, %v636_v50 }
 0x262   : > { %721 = vst.msk [vmem:[#allocation2] sm:$0xff] %vm720_vm3, %v719_v51 }
 0x269   : > { %v722_v52 = vld [vmem:[#allocation2] sm:$0xff] }
 0x26a   : > { %723 = vst [vmem:[%s264_s12] sm:$0xff] %v722_v52 }
 0x26b   : > { %1044 = shalt.err (!%p1041_p9)
}
 0x26c   : > { %s1045_s30 = scalar_lea.hbm %s1306_s15, 128  ;;  %s1049_s10 = scalar_lea.hbm %s1364_s5, 512 }
 0x26d   : > { %p1046_p10 = scmp.ne.s32.totalorder %s1306_s15, %s1045_s30  ;;  %p1050_p13 = scmp.lt.u32.totalorder %s1306_s15, %s1364_s5 }
 0x26e   : > { %p1051_p0 = scmp.lt.u32.totalorder %s1049_s10, %s1045_s30  ;;  %p1053_p2 = scmp.lt.u32.totalorder %s1045_s30, %s1306_s15 }
 0x26f   : > { %p1047_p11 = pnand %p1046_p10, %p1216_p3 }
 0x270   : > { %p1052_p1 = por %p1051_p0, %p1050_p13 }
 0x271   : > { %p1048_p12 = pneg %p1047_p11 }
 0x272   : > { %p1054_p4 = por %p1053_p2, %p1052_p1 }
 0x274   : > { %p1055_p5 = pnand %p1054_p4, %p1048_p12 }
 0x276   : > { %1058 = shalt.err (!%p1055_p5)
}
 0x277   : > { %943 = dma.vmem_to_hbm [thread:$0]  (%p1216_p3), %s1308_s21, 128, %s1306_s15, %s725_s14  }
 0x278 PF: > { %p949_p6 = scmp.ge.s32.totalorder %s1125_s25, 2  ;;  %s752_s13 = sand.u32 1, %s1097_s18  }
 0x279   : > { %s753_s16 = scalar_lea.sflag [#allocation4], %s752_s13 }
 0x27a   : > { %p946_p7 = pnand %p949_p6, %p1225_p8 }
 0x27c   : > { %1092 = dma.done.wait (!%p946_p7), %s753_s16, 128  }
 0x27d   : > { %1094 = vsyncadd (!%p946_p7), %s753_s16, 4294967168  ;;  %s18_s25 = sadd.s32 1, %s1125_s25   ;;  %s1367_s18 = smov %s1101_s19 }
 0x27e   : > { %p15_p9 = scmp.ge.s32.totalorder %s18_s25, 6   ;;  %s1368_s19 = smov %s1105_s20 }
 0x27f   : > { %s1369_s20 = smov %s1234_s11  ;;  %s1370_s21 = smov %s1117_s23 }
 0x280   : > { %s1371_s22 = smov %s1121_s24  ;;  %s1372_s23 = smov %s1375_s28 }
 0x281   : > { %s1373_s24 = smov %s1379_s29  ;;  %17 = sbr.rel (!%p15_p9) target bundleno = 5 (0x5), region = 81 }
 0x288   :  { %758 = vsyncpa [#allocation4], 1 }
 0x289   :  { %760 = vsyncpa [#allocation4 + $0x1], 1 }

</bundles_post_ra>
